<compile_context>
chip_gen: v6e
topology: v6e:2x2x1
jax: 0.10.0
libtpu: 0.0.40
codegen_flags: <defaults>
</compile_context>

<pallas_src>
import math

import jax
import jax.numpy as jnp
from jax.experimental import pallas as pl
from jax.experimental.pallas import tpu as pltpu


def _round_up(a: int, b: int) -> int:
    return (a + b - 1) // b * b


# ----------------------------- GELU (exact erf) ------------------------------

_INV_SQRT2 = 0.7071067811865476
_ERF_P = 0.3275911
_ERF_A1, _ERF_A2, _ERF_A3, _ERF_A4, _ERF_A5 = (
    0.254829592, -0.284496736, 1.421413741, -1.453152027, 1.061405429)


def _gelu_exact(g):
    """PyTorch-default GELU: 0.5*g*(1+erf(g/sqrt(2))), erf via A&S 7.1.26."""
    z = g * _INV_SQRT2
    az = jnp.abs(z)
    t = 1.0 / (1.0 + _ERF_P * az)
    poly = ((((_ERF_A5 * t + _ERF_A4) * t + _ERF_A3) * t + _ERF_A2) * t
            + _ERF_A1) * t
    erf_abs = 1.0 - poly * jnp.exp(-(z * z))       # z*z == |z|*|z|: one abs saved
    erf = jnp.where(z < 0, -erf_abs, erf_abs)
    return 0.5 * g * (1.0 + erf)


# --------------------------------- kernel ------------------------------------

def _geglu_kernel(x_ref, wv_ref, wg_ref, bv_ref, bg_ref, o_ref):
    """One (TM, TN) output tile: v = xWv+bv ; g = xWg+bg ; out = v * gelu(g)."""
    x = x_ref[...]                                                   # (TM, K)
    v = jnp.dot(x, wv_ref[...], preferred_element_type=jnp.float32) + bv_ref[...]
    g = jnp.dot(x, wg_ref[...], preferred_element_type=jnp.float32) + bg_ref[...]
    o_ref[...] = (v * _gelu_exact(g)).astype(o_ref.dtype)


# ------------------------------- param prep ----------------------------------

def prepare_geglu_params(w, b, dim_out, compute_dtype=jnp.bfloat16):
    """Split nn.Linear(dim_in, 2*dim_out) params into value/gate halves, pad the
    output dim to a lane-dense multiple of 128, and cast weights to the MXU
    compute dtype (bf16 by default).  Biases stay f32 (added to f32 accum).
    Done once at init so the per-call hot path has zero wrapper copies."""
    n_pad = _round_up(dim_out, 128)
    pad = n_pad - dim_out
    w_v = jnp.pad(w[:, :dim_out], ((0, 0), (0, pad))).astype(compute_dtype)
    w_g = jnp.pad(w[:, dim_out:], ((0, 0), (0, pad))).astype(compute_dtype)
    b_v = jnp.pad(b[:dim_out], (0, pad)).reshape(1, n_pad).astype(jnp.float32)
    b_g = jnp.pad(b[dim_out:], (0, pad)).reshape(1, n_pad).astype(jnp.float32)
    return w_v, w_g, b_v, b_g


# ------------------------------ tile selection --------------------------------

def _vmem_capacity_bytes() -> int:
    try:
        return int(pltpu.get_tpu_info().vmem_capacity_bytes)
    except Exception:
        return 64 * 1024 * 1024          # v7x-safe fallback (smallest VMEM)


def _block_vmem_bytes(tm, tn, k, in_itemsize, out_itemsize):
    x_b = tm * k * in_itemsize
    w_b = 2 * k * tn * in_itemsize
    b_b = 2 * tn * 4
    o_b = tm * tn * out_itemsize
    return 2 * (x_b + w_b + b_b + o_b)   # x2 for double-buffered pipelining


def _pick_tiles(m, n_pad, k, in_itemsize, out_itemsize, vmem_budget):
    """Largest (TM, TN) that fit the VMEM budget; prefer wide TN (fewer x
    re-reads after the weight-resident grid reorder)."""
    sub = 16 if in_itemsize < 4 else 8               # bf16 packs 2 rows/sublane
    m_align = _round_up(max(m, 1), sub)
    tn_cands = [t for t in (512, 256, 128) if n_pad % t == 0]
    tm_cands = [t for t in (512, 256, 128) if t <= m_align] or [m_align]

    best = None
    for tn in tn_cands:
        for tm in tm_cands:
            if _block_vmem_bytes(tm, tn, k, in_itemsize, out_itemsize) > vmem_budget:
                continue
            score = (tm * tn, tn)
            if best is None or score > best[1]:
                best = ((tm, tn), score)
    if best is None:
        return tm_cands[-1], tn_cands[-1]
    return best[0]


# --------------------------------- wrapper ------------------------------------

def geglu(x, params, dim_out, out_dtype=None):
    """GEGLU forward. x: (..., dim_in). Returns (..., dim_out)."""
    w_v, w_g, b_v, b_g = params
    compute_dtype = w_v.dtype
    out_dtype = out_dtype if out_dtype is not None else x.dtype

    orig_shape = x.shape
    k = orig_shape[-1]
    m = math.prod(orig_shape[:-1]) if len(orig_shape) > 1 else 1
    n_pad = w_v.shape[1]

    in_itemsize = jnp.dtype(compute_dtype).itemsize
    out_itemsize = jnp.dtype(out_dtype).itemsize

    vmem_cap = _vmem_capacity_bytes()
    tm, tn = _pick_tiles(m, n_pad, k, in_itemsize, out_itemsize,
                         int(vmem_cap * 0.7))
    m_pad = _round_up(m, tm)

    x2 = x.reshape(m, k).astype(compute_dtype)
    if m_pad != m:                                   # skipped in aligned case
        x2 = jnp.pad(x2, ((0, m_pad - m), (0, 0)))

    n_tiles = n_pad // tn
    m_tiles = m_pad // tm
    # N is the OUTER grid axis, M the inner: weight/bias block indices are
    # constant over the inner loop, so their DMA is issued once per N stripe.
    grid = (n_tiles, m_tiles)

    needed = _block_vmem_bytes(tm, tn, k, in_itemsize, out_itemsize)
    vmem_limit = int(min(max(needed * 3 // 2, 32 * 1024 * 1024),
                         max(vmem_cap - (8 << 20), 32 << 20)))

    cost = pl.CostEstimate(
        flops=2 * m_pad * k * (2 * n_pad),
        transcendentals=m_pad * n_pad,
        bytes_accessed=(m_pad * k * n_tiles * in_itemsize   # x, once per N stripe
                        + 2 * k * n_pad * in_itemsize       # weights, once
                        + 2 * n_pad * 4                     # biases
                        + m_pad * n_pad * out_itemsize),    # output, once
    )

    out = pl.pallas_call(
        _geglu_kernel,
        out_shape=jax.ShapeDtypeStruct((m_pad, n_pad), out_dtype),
        grid=grid,
        in_specs=[
            pl.BlockSpec((tm, k), lambda j, i: (i, 0)),   # x tile (varies on i)
            pl.BlockSpec((k, tn), lambda j, i: (0, j)),   # Wv (resident over i)
            pl.BlockSpec((k, tn), lambda j, i: (0, j)),   # Wg (resident over i)
            pl.BlockSpec((1, tn), lambda j, i: (0, j)),   # bv (resident over i)
            pl.BlockSpec((1, tn), lambda j, i: (0, j)),   # bg (resident over i)
        ],
        out_specs=pl.BlockSpec((tm, tn), lambda j, i: (i, j)),
        compiler_params=pltpu.CompilerParams(
            dimension_semantics=("parallel", "parallel"),
            vmem_limit_bytes=vmem_limit,
        ),
        cost_estimate=cost,
    )(x2, w_v, w_g, b_v, b_g)

    if m_pad != m or n_pad != dim_out:                # skipped in aligned case
        out = out[:m, :dim_out]
    return out.reshape(orig_shape[:-1] + (dim_out,))


def geglu_reference(x, w, b):
    """Pure-JAX reference with PyTorch-default (exact erf) GELU."""
    y = x @ w + b
    v, g = jnp.split(y, 2, axis=-1)
    return v * jax.nn.gelu(g, approximate=False)


# ----------------------------------- demo -------------------------------------

if __name__ == "__main__":
    key = jax.random.PRNGKey(0)
    k_x, k_w, k_b = jax.random.split(key, 3)

    # Small shapes consistent with GEGLU in a transformer feed-forward:
    # x: (batch, seq, dim_in), proj: dim_in -> 2*dim_out.
    B, S, DIM_IN, DIM_OUT = 2, 8, 64, 128
    x = jax.random.normal(k_x, (B, S, DIM_IN), jnp.float32)

    # nn.Linear(dim_in, 2*dim_out) init: U(-1/sqrt(fan_in), 1/sqrt(fan_in)),
    # stored already transposed to (dim_in, 2*dim_out).
    bound = 1.0 / math.sqrt(DIM_IN)
    w = jax.random.uniform(k_w, (DIM_IN, 2 * DIM_OUT), jnp.float32, -bound, bound)
    b = jax.random.uniform(k_b, (2 * DIM_OUT,), jnp.float32, -bound, bound)

    ref = geglu_reference(x, w, b)

    # f32 path: tight numerical check against the PyTorch-semantics reference.
    params_f32 = prepare_geglu_params(w, b, DIM_OUT, compute_dtype=jnp.float32)
    out_f32 = jax.block_until_ready(geglu(x, params_f32, DIM_OUT))
    assert out_f32.shape == (B, S, DIM_OUT), out_f32.shape
    err_f32 = float(jnp.max(jnp.abs(out_f32 - ref)))
    assert jnp.allclose(out_f32, ref, atol=1e-4, rtol=1e-4), f"f32 max_err={err_f32}"

    # bf16 performance path: bf16 MXU inputs, f32 accumulation + f32 epilogue.
    params_bf16 = prepare_geglu_params(w, b, DIM_OUT, compute_dtype=jnp.bfloat16)
    out_bf16 = jax.block_until_ready(geglu(x, params_bf16, DIM_OUT))
    assert out_bf16.shape == (B, S, DIM_OUT), out_bf16.shape
    err_bf16 = float(jnp.max(jnp.abs(out_bf16.astype(jnp.float32) - ref)))
    assert jnp.allclose(out_bf16.astype(jnp.float32), ref, atol=3e-2, rtol=3e-2), \
        f"bf16 max_err={err_bf16}"

    print("KERNEL_OK")
</pallas_src>

<mosaic_0001>
module attributes {stable_mosaic.version = 11 : i64} {
  func.func @_geglu_kernel(%arg0: i32, %arg1: i32, %arg2: memref<16x64xf32, #tpu.memory_space<vmem>>, %arg3: memref<64x128xf32, #tpu.memory_space<vmem>>, %arg4: memref<64x128xf32, #tpu.memory_space<vmem>>, %arg5: memref<1x128xf32, #tpu.memory_space<vmem>>, %arg6: memref<1x128xf32, #tpu.memory_space<vmem>>, %arg7: memref<16x128xf32, #tpu.memory_space<vmem>>) attributes {dimension_semantics = [#tpu.dimension_semantics<parallel>, #tpu.dimension_semantics<parallel>], iteration_bounds = array<i64: 1, 1>, scalar_prefetch = 0 : i64, scratch_operands = 0 : i64, tpu.core_type = #tpu.core_type<tc>, window_params = [{transform_indices = @transform_0, window_bounds = array<i64: 16, 64>}, {transform_indices = @transform_1, window_bounds = array<i64: 64, 128>}, {transform_indices = @transform_2, window_bounds = array<i64: 64, 128>}, {transform_indices = @transform_3, window_bounds = array<i64: 1, 128>}, {transform_indices = @transform_4, window_bounds = array<i64: 1, 128>}, {transform_indices = @transform_5, window_bounds = array<i64: 16, 128>}]} {
    %c0 = arith.constant 0 : index
    %c0_0 = arith.constant 0 : index
    %0 = vector.load %arg2[%c0, %c0_0] : memref<16x64xf32, #tpu.memory_space<vmem>>, vector<16x64xf32>
    %c0_1 = arith.constant 0 : index
    %c0_2 = arith.constant 0 : index
    %1 = vector.load %arg3[%c0_1, %c0_2] : memref<64x128xf32, #tpu.memory_space<vmem>>, vector<64x128xf32>
    %cst = arith.constant dense<0.000000e+00> : vector<16x128xf32>
    %2 = tpu.matmul %0, %1, %cst {dimension_numbers = #tpu.dot_dimension_numbers<[1], [0], [0], [1], [0, 0, 1, 1], [], []>} : vector<16x64xf32>, vector<64x128xf32>, vector<16x128xf32> -> vector<16x128xf32>
    %c0_3 = arith.constant 0 : index
    %c0_4 = arith.constant 0 : index
    %3 = vector.load %arg5[%c0_3, %c0_4] : memref<1x128xf32, #tpu.memory_space<vmem>>, vector<1x128xf32>
    %4 = vector.broadcast %3 : vector<1x128xf32> to vector<16x128xf32>
    %5 = arith.addf %2, %4 : vector<16x128xf32>
    %c0_5 = arith.constant 0 : index
    %c0_6 = arith.constant 0 : index
    %6 = vector.load %arg4[%c0_5, %c0_6] : memref<64x128xf32, #tpu.memory_space<vmem>>, vector<64x128xf32>
    %cst_7 = arith.constant dense<0.000000e+00> : vector<16x128xf32>
    %7 = tpu.matmul %0, %6, %cst_7 {dimension_numbers = #tpu.dot_dimension_numbers<[1], [0], [0], [1], [0, 0, 1, 1], [], []>} : vector<16x64xf32>, vector<64x128xf32>, vector<16x128xf32> -> vector<16x128xf32>
    %c0_8 = arith.constant 0 : index
    %c0_9 = arith.constant 0 : index
    %8 = vector.load %arg6[%c0_8, %c0_9] : memref<1x128xf32, #tpu.memory_space<vmem>>, vector<1x128xf32>
    %9 = vector.broadcast %8 : vector<1x128xf32> to vector<16x128xf32>
    %10 = arith.addf %7, %9 : vector<16x128xf32>
    %cst_10 = arith.constant 0.707106769 : f32
    %11 = vector.broadcast %cst_10 : f32 to vector<16x128xf32>
    %12 = arith.mulf %10, %11 : vector<16x128xf32>
    %13 = math.absf %12 : vector<16x128xf32>
    %cst_11 = arith.constant 0.327591091 : f32
    %14 = vector.broadcast %cst_11 : f32 to vector<16x128xf32>
    %15 = arith.mulf %14, %13 : vector<16x128xf32>
    %cst_12 = arith.constant 1.000000e+00 : f32
    %16 = vector.broadcast %cst_12 : f32 to vector<16x128xf32>
    %17 = arith.addf %16, %15 : vector<16x128xf32>
    %cst_13 = arith.constant 1.000000e+00 : f32
    %18 = vector.broadcast %cst_13 : f32 to vector<16x128xf32>
    %19 = arith.divf %18, %17 : vector<16x128xf32>
    %cst_14 = arith.constant 1.06140542 : f32
    %20 = vector.broadcast %cst_14 : f32 to vector<16x128xf32>
    %21 = arith.mulf %20, %19 : vector<16x128xf32>
    %cst_15 = arith.constant -1.45315206 : f32
    %22 = vector.broadcast %cst_15 : f32 to vector<16x128xf32>
    %23 = arith.addf %21, %22 : vector<16x128xf32>
    %24 = arith.mulf %23, %19 : vector<16x128xf32>
    %cst_16 = arith.constant 1.42141378 : f32
    %25 = vector.broadcast %cst_16 : f32 to vector<16x128xf32>
    %26 = arith.addf %24, %25 : vector<16x128xf32>
    %27 = arith.mulf %26, %19 : vector<16x128xf32>
    %cst_17 = arith.constant -0.284496725 : f32
    %28 = vector.broadcast %cst_17 : f32 to vector<16x128xf32>
    %29 = arith.addf %27, %28 : vector<16x128xf32>
    %30 = arith.mulf %29, %19 : vector<16x128xf32>
    %cst_18 = arith.constant 0.254829586 : f32
    %31 = vector.broadcast %cst_18 : f32 to vector<16x128xf32>
    %32 = arith.addf %30, %31 : vector<16x128xf32>
    %33 = arith.mulf %32, %19 : vector<16x128xf32>
    %34 = arith.mulf %12, %12 : vector<16x128xf32>
    %cst_19 = arith.constant 0.000000e+00 : f32
    %35 = vector.broadcast %cst_19 : f32 to vector<16x128xf32>
    %36 = arith.subf %35, %34 : vector<16x128xf32>
    %37 = math.exp %36 : vector<16x128xf32>
    %38 = arith.mulf %33, %37 : vector<16x128xf32>
    %cst_20 = arith.constant 1.000000e+00 : f32
    %39 = vector.broadcast %cst_20 : f32 to vector<16x128xf32>
    %40 = arith.subf %39, %38 : vector<16x128xf32>
    %cst_21 = arith.constant 0.000000e+00 : f32
    %41 = vector.broadcast %cst_21 : f32 to vector<16x128xf32>
    %42 = arith.cmpf olt, %12, %41 : vector<16x128xf32>
    %cst_22 = arith.constant 0.000000e+00 : f32
    %43 = vector.broadcast %cst_22 : f32 to vector<16x128xf32>
    %44 = arith.subf %43, %40 : vector<16x128xf32>
    %45 = arith.select %42, %44, %40 : vector<16x128xi1>, vector<16x128xf32>
    %cst_23 = arith.constant 5.000000e-01 : f32
    %46 = vector.broadcast %cst_23 : f32 to vector<16x128xf32>
    %47 = arith.mulf %46, %10 : vector<16x128xf32>
    %cst_24 = arith.constant 1.000000e+00 : f32
    %48 = vector.broadcast %cst_24 : f32 to vector<16x128xf32>
    %49 = arith.addf %48, %45 : vector<16x128xf32>
    %50 = arith.mulf %47, %49 : vector<16x128xf32>
    %51 = arith.mulf %5, %50 : vector<16x128xf32>
    %c0_25 = arith.constant 0 : index
    %c0_26 = arith.constant 0 : index
    %52 = vector.load %arg7[%c0_25, %c0_26] : memref<16x128xf32, #tpu.memory_space<vmem>>, vector<16x128xf32>
    tpu.vector_store %arg7[%c0_25, %c0_26], %51 {strides = array<i32>} : memref<16x128xf32, #tpu.memory_space<vmem>>, vector<16x128xf32>,
    return
  }
  func.func @transform_0(%arg0: i32, %arg1: i32) -> (i32, i32) {
    %c0_i32 = arith.constant 0 : i32
    %c0_i32_0 = arith.constant 0 : i32
    return %arg1, %c0_i32 : i32, i32
  }
  func.func @transform_1(%arg0: i32, %arg1: i32) -> (i32, i32) {
    %c0_i32 = arith.constant 0 : i32
    %c0_i32_0 = arith.constant 0 : i32
    return %c0_i32, %arg0 : i32, i32
  }
  func.func @transform_2(%arg0: i32, %arg1: i32) -> (i32, i32) {
    %c0_i32 = arith.constant 0 : i32
    %c0_i32_0 = arith.constant 0 : i32
    return %c0_i32, %arg0 : i32, i32
  }
  func.func @transform_3(%arg0: i32, %arg1: i32) -> (i32, i32) {
    %c0_i32 = arith.constant 0 : i32
    %c0_i32_0 = arith.constant 0 : i32
    return %c0_i32, %arg0 : i32, i32
  }
  func.func @transform_4(%arg0: i32, %arg1: i32) -> (i32, i32) {
    %c0_i32 = arith.constant 0 : i32
    %c0_i32_0 = arith.constant 0 : i32
    return %c0_i32, %arg0 : i32, i32
  }
  func.func @transform_5(%arg0: i32, %arg1: i32) -> (i32, i32) {
    %c0_i32 = arith.constant 0 : i32
    return %arg1, %arg0 : i32, i32
  }
}

</mosaic_0001>

<bundles_post_ra>
// kernel: tpu_custom_call.1
= control target key start
LH: loop header
LB: loop body
LE: loop exit
PB: predicated region body
PF: predicated region fallthrough
CT: control target
= control target key end

     0   :  { %10 = vsyncpa [#allocation3], 0  ;;  %s561_s0 = inlined_call_operand.hbm [shape: f32[16,64], index: 0, kind: input, shape index: {}]   ;;  %s562_s1 = inlined_call_operand.hbm [shape: f32[64,128], index: 1, kind: input, shape index: {}]   ;;  %s563_s2 = inlined_call_operand.hbm [shape: f32[64,128], index: 2, kind: input, shape index: {}]   ;;  %s564_s3 = inlined_call_operand.vmem [shape: f32[1,128], index: 3, kind: input, shape index: {}]   ;;  %s565_s4 = inlined_call_operand.vmem [shape: f32[1,128], index: 4, kind: input, shape index: {}]   ;;  %s566_s5 = inlined_call_operand.hbm [shape: f32[16,128], index: 5, kind: output, shape index: {}]  }
   0x1   :  { %11 = vsyncpa [#allocation6], 0 }
   0x2   :  { %12 = vsyncpa [#allocation4], 0  ;;  %s491_s18 = smov [#allocation5]   ;;  %s492_s20 = smov [#allocation2]  }
   0x3   :  { %s30_s19 = sshll.u32 %s491_s18, 4  ;;  %s18_s21 = sshll.u32 %s492_s20, 4  ;;  %s31_s19 = int_to_ptr.vmem [resolvable:$true] %s30_s19  ;;  %s19_s21 = int_to_ptr.vmem [resolvable:$true] %s18_s21 }
   0x4   :  { %s413_s22 = scalar_lea.vmem %s31_s19, 1024  ;;  %p418_p1 = scmp.lt.s32.totalorder %s31_s19, %s31_s19 }
   0x5   :  { %p414_p0 = scmp.ne.s32.totalorder %s31_s19, %s413_s22  ;;  %p419_p2 = scmp.lt.s32.totalorder %s413_s22, %s413_s22 }
   0x7   :  { %p420_p3 = por %p419_p2, %p418_p1 }
   0x9   :  { %p421_p4 = pnand %p420_p3, %p414_p0 }
   0xb   :  { %424 = shalt.err (!%p421_p4)
}
   0xc   :  { %s493_s23 = smov 128   ;;  %s494_s24 = smov 8  }
   0xd   :  { %36 = dma.hbm_to_vmem [thread:$0]  %s562_s1, 1024, %s31_s19, [#allocation6], %s493_s23, %s493_s23, %s494_s24  }
   0xe   :  { %s433_s27 = scalar_lea.vmem %s19_s21, 256  ;;  %p438_p6 = scmp.lt.s32.totalorder %s19_s21, %s19_s21 }
   0xf   :  { %p434_p5 = scmp.ne.s32.totalorder %s19_s21, %s433_s27  ;;  %p439_p7 = scmp.lt.s32.totalorder %s433_s27, %s433_s27 }
  0x11   :  { %p440_p8 = por %p439_p7, %p438_p6 }
  0x13   :  { %p441_p9 = pnand %p440_p8, %p434_p5 }
  0x15   :  { %444 = shalt.err (!%p441_p9)
}
  0x16   :  { %24 = dma.hbm_to_vmem [thread:$0]  %s561_s0, 256, %s19_s21, [#allocation3], %s493_s23, %s493_s23, %s494_s24  }
  0x17   :  { %s495_s30 = smov [#allocation7]  }
  0x18   :  { %s42_s6 = sshll.u32 %s495_s30, 4  ;;  %s43_s6 = int_to_ptr.vmem [resolvable:$true] %s42_s6 }
  0x19   :  { %s453_s7 = scalar_lea.vmem %s43_s6, 1024  ;;  %p458_p11 = scmp.lt.s32.totalorder %s43_s6, %s43_s6 }
  0x1a   :  { %p454_p10 = scmp.ne.s32.totalorder %s43_s6, %s453_s7  ;;  %p459_p12 = scmp.lt.s32.totalorder %s453_s7, %s453_s7 }
  0x1c   :  { %p460_p13 = por %p459_p12, %p458_p11 }
  0x1e   :  { %p461_p0 = pnand %p460_p13, %p454_p10 }
  0x20   :  { %464 = shalt.err (!%p461_p0)
}
  0x21   :  { %48 = dma.hbm_to_vmem [thread:$0]  %s563_s2, 1024, %s43_s6, [#allocation6], %s493_s23, %s493_s23, %s494_s24  }
  0x22   :  { %485 = dma.done.wait [#allocation3], 256  }
  0x23   :  { %486 = vsyncadd [#allocation3], 4294967040 }
  0x24   :  { %487 = dma.done.wait [#allocation6], 2048  }
  0x25   :  { %488 = vsyncadd [#allocation6], 4294965248  ;;  %v168_v0 = vld [vmem:[#allocation7 + $0x38] sm:$0xff]  ;;  %v167_v1 = vld [vmem:[#allocation7 + $0x30] sm:$0xff]  ;;  %vm79_vm0 = vcmask 523264   ;;  %s496_s10 = smov [#allocation8]  }
  0x26   :  { %372 = vmatprep.subr.mxu1 %v168_v0  ;;  %v166_v2 = vld [vmem:[#allocation7 + $0x28] sm:$0xff]  ;;  %v62_v3 = vld [vmem:[#allocation2] sm:$0xff]  ;;  %v71_v4 = vld [vmem:[#allocation5 + $0x38] sm:$0xff]  ;;  %s314_s11 = sshll.u32 %s496_s10, 4  ;;  %s315_s11 = int_to_ptr.vmem [resolvable:$true] %s314_s11 }
  0x27   :  { %373 = vmatpush3.msra.mxu1 %v168_v0  ;;  %388 = vmatprep.mubr.msk.f32.mxu1 %vm79_vm0, %v62_v3  ;;  %v70_v5 = vld [vmem:[#allocation5 + $0x30] sm:$0xff]  ;;  %v165_v6 = vld [vmem:[#allocation7 + $0x20] sm:$0xff]  ;;  %v69_v7 = vld [vmem:[#allocation5 + $0x28] sm:$0xff]  ;;  %p470_p2 = scmp.lt.s32.totalorder %s315_s11, %s315_s11 }
  0x28   :  { %374 = vmatprep.subr.mxu1 %v167_v1  ;;  %353 = vmatprep.subr.mxu0 %v71_v4  ;;  %v164_v8 = vld [vmem:[#allocation7 + $0x18] sm:$0xff]  ;;  %v68_v9 = vld [vmem:[#allocation5 + $0x20] sm:$0xff]  ;;  %v163_v10 = vld [vmem:[#allocation7 + $0x10] sm:$0xff] }
  0x29   :  { %375 = vmatpush3.msra.mxu1 %v167_v1  ;;  %354 = vmatpush3.msra.mxu0 %v71_v4  ;;  %v67_v11 = vld [vmem:[#allocation5 + $0x18] sm:$0xff]  ;;  %v162_v12 = vld [vmem:[#allocation7 + $0x8] sm:$0xff]  ;;  %v66_v13 = vld [vmem:[#allocation5 + $0x10] sm:$0xff] }
  0x2a   :  { %376 = vmatprep.subr.mxu1 %v166_v2  ;;  %355 = vmatprep.subr.mxu0 %v70_v5  ;;  %v161_v14 = vld [vmem:[#allocation7] sm:$0xff]  ;;  %v65_v15 = vld [vmem:[#allocation5 + $0x8] sm:$0xff]  ;;  %v63_v16 = vld [vmem:[#allocation2 + $0x8] sm:$0xff] }
  0x2b   :  { %377 = vmatpush3.msra.mxu1 %v166_v2  ;;  %356 = vmatpush3.msra.mxu0 %v70_v5  ;;  %v64_v17 = vld [vmem:[#allocation5] sm:$0xff]  ;;  %v330_v18 = vld [vmem:[%s565_s4] ss:$0 sm:$0xff] }
  0x2c   :  { %378 = vmatprep.subr.mxu1 %v165_v6  ;;  %357 = vmatprep.subr.mxu0 %v69_v7  ;;  %v327_v63 = vld [vmem:[%s564_s3] ss:$0 sm:$0xff]  ;;  %s465_s3 = scalar_lea.vmem %s315_s11, 256 }
  0x2d   :  { %379 = vmatpush3.msra.mxu1 %v165_v6  ;;  %358 = vmatpush3.msra.mxu0 %v69_v7  ;;  %p466_p1 = scmp.ne.s32.totalorder %s315_s11, %s465_s3  ;;  %p471_p3 = scmp.lt.s32.totalorder %s465_s3, %s465_s3 }
  0x2e   :  { %380 = vmatprep.subr.mxu1 %v164_v8  ;;  %359 = vmatprep.subr.mxu0 %v68_v9 }
  0x2f   :  { %381 = vmatpush3.msra.mxu1 %v164_v8  ;;  %360 = vmatpush3.msra.mxu0 %v68_v9  ;;  %p472_p4 = por %p471_p3, %p470_p2 }
  0x30   :  { %382 = vmatprep.subr.mxu1 %v163_v10  ;;  %361 = vmatprep.subr.mxu0 %v67_v11 }
  0x31   :  { %383 = vmatpush3.msra.mxu1 %v163_v10  ;;  %362 = vmatpush3.msra.mxu0 %v67_v11  ;;  %p473_p5 = pnand %p472_p4, %p466_p1 }
  0x32   :  { %384 = vmatprep.subr.mxu1 %v162_v12  ;;  %363 = vmatprep.subr.mxu0 %v66_v13 }
  0x33   :  { %385 = vmatpush3.msra.mxu1 %v162_v12  ;;  %364 = vmatpush3.msra.mxu0 %v66_v13 }
  0x34   :  { %386 = vmatprep.subr.mxu1 %v161_v14  ;;  %365 = vmatprep.subr.mxu0 %v65_v15 }
  0x35   :  { %387 = vmatpush3.msra.mxu1 %v161_v14  ;;  %366 = vmatpush3.msra.mxu0 %v65_v15 }
  0x36   :  { %389 = vmatmul.mubr.msk.f32.vlgmr.msra.gmra.mxu1 %vm79_vm0, %v63_v16  ;;  %367 = vmatprep.subr.mxu0 %v64_v17 }
  0x37   :  { %369 = vmatprep.mubr.msk.f32.mxu0 %vm79_vm0, %v62_v3  ;;  %368 = vmatpush3.msra.mxu0 %v64_v17 }
  0x38   :  { %370 = vmatmul.mubr.msk.f32.vlgmr.msra.gmra.mxu0 %vm79_vm0, %v63_v16 }
  0xf6   :  { %v390_v19 = vpop.f32.mrf.mxu1 }
  0xf7   :  { %v248_v20 = vadd.f32 %v390_v19, %v330_v18 }
  0xf8   :  { %v242_v21 = vpop.f32.mrf.mxu1  ;;  %v371_v62 = vpop.f32.mrf.mxu0 }
  0xf9   :  { %v252_v22 = vmul.f32 0.70710677, %v248_v20  ;;  %v243_v23 = vadd.f32 %v330_v18, %v242_v21  ;;  %v300_v4 = vmul.f32 0.5, %v248_v20  ;;  %v158_v5 = vadd.f32 %v371_v62, %v327_v63 }
  0xfa   :  { %v152_v7 = vpop.f32.mrf.mxu0 }
  0xfb   :  { %v254_v24 = vand.u32 2147483647, %v252_v22  ;;  %v251_v25 = vmul.f32 0.70710677, %v243_v23  ;;  %v282_v31 = vmul.f32 %v252_v22, %v252_v22  ;;  %vm294_vm1 = vcmp.lt.f32.partialorder %v252_v22, 0.0 }
  0xfc   :  { %v299_v9 = vmul.f32 0.5, %v243_v23  ;;  %v153_v13 = vadd.f32 %v327_v63, %v152_v7 }
  0xfd   :  { %v256_v26 = vmul.f32 0.3275911, %v254_v24  ;;  %v253_v27 = vand.u32 2147483647, %v251_v25  ;;  %v281_v32 = vmul.f32 %v251_v25, %v251_v25  ;;  %v284_v33 = vsub.f32 0.0, %v282_v31 }
  0xfe   :  { %vm293_vm2 = vcmp.lt.f32.partialorder %v251_v25, 0.0 }
  0xff   :  { %v258_v28 = vadd.f32 1.0, %v256_v26  ;;  %v255_v29 = vmul.f32 0.3275911, %v253_v27  ;;  %v283_v34 = vsub.f32 0.0, %v281_v32  ;;  %v287_v36 = vmul.f32 1.442695, %v284_v33 }
 0x101   :  { %397 = vrcp.f32 %v258_v28  ;;  %v257_v30 = vadd.f32 1.0, %v255_v29  ;;  %v285_v39 = vmul.f32 1.442695, %v283_v34 }
 0x103   :  { %399 = vrcp.f32 %v257_v30 }
 0x104   :  { %401 = vpow2.f32 %v287_v36 }
 0x105   :  { %403 = vpow2.f32 %v285_v39 }
 0x10e   :  { %v398_v35 = vpop.eup %397 }
 0x10f   :  { %v264_v37 = vmul.f32 1.0614054, %v398_v35 }
 0x110   :  { %v400_v38 = vpop.eup %399 }
 0x111   :  { %v266_v40 = vadd.f32 -1.4531521, %v264_v37  ;;  %v263_v41 = vmul.f32 1.0614054, %v400_v38  ;;  %v402_v56 = vpop.eup %401 }
 0x112   :  { %v404_v59 = vpop.eup %403 }
 0x113   :  { %v268_v42 = vmul.f32 %v398_v35, %v266_v40  ;;  %v265_v43 = vadd.f32 -1.4531521, %v263_v41 }
 0x115   :  { %v270_v44 = vadd.f32 1.4214138, %v268_v42  ;;  %v267_v45 = vmul.f32 %v400_v38, %v265_v43 }
 0x117   :  { %v272_v46 = vmul.f32 %v398_v35, %v270_v44  ;;  %v269_v47 = vadd.f32 1.4214138, %v267_v45 }
 0x119   :  { %v274_v48 = vadd.f32 -0.28449672, %v272_v46  ;;  %v271_v49 = vmul.f32 %v400_v38, %v269_v47 }
 0x11b   :  { %v276_v50 = vmul.f32 %v398_v35, %v274_v48  ;;  %v273_v51 = vadd.f32 -0.28449672, %v271_v49 }
 0x11d   :  { %v278_v52 = vadd.f32 0.2548296, %v276_v50  ;;  %v275_v53 = vmul.f32 %v400_v38, %v273_v51 }
 0x11f   :  { %v280_v54 = vmul.f32 %v398_v35, %v278_v52  ;;  %v277_v55 = vadd.f32 0.2548296, %v275_v53 }
 0x121   :  { %v290_v57 = vmul.f32 %v402_v56, %v280_v54  ;;  %v279_v58 = vmul.f32 %v400_v38, %v277_v55 }
 0x123   :  { %v292_v60 = vsub.f32 1.0, %v290_v57  ;;  %v289_v61 = vmul.f32 %v404_v59, %v279_v58 }
 0x125   :  { %v296_v0 = vsub.f32 0.0, %v292_v60  ;;  %v291_v1 = vsub.f32 1.0, %v289_v61 }
 0x127   :  { %v298_v2 = vsel %vm294_vm1, %v296_v0, %v292_v60  ;;  %v295_v3 = vsub.f32 0.0, %v291_v1 }
 0x128   :  { %v302_v6 = vadd.f32 1.0, %v298_v2 }
 0x129   :  { %v297_v8 = vsel %vm293_vm2, %v295_v3, %v291_v1 }
 0x12a   :  { %v304_v10 = vmul.f32 %v302_v6, %v300_v4  ;;  %v301_v11 = vadd.f32 1.0, %v297_v8 }
 0x12c   :  { %v306_v12 = vmul.f32 %v304_v10, %v158_v5  ;;  %v303_v14 = vmul.f32 %v301_v11, %v299_v9 }
 0x12e   :  { %308 = vst [vmem:[#allocation8 + $0x8] sm:$0xff] %v306_v12  ;;  %v305_v15 = vmul.f32 %v303_v14, %v153_v13 }
 0x130   :  { %307 = vst [vmem:[#allocation8] sm:$0xff] %v305_v15 }
 0x131   :  { %476 = shalt.err (!%p473_p5)
}
 0x132   :  { %320 = dma.vmem_to_hbm [thread:$0]  %s315_s11, 256, %s566_s5, [#allocation4], %s493_s23, %s493_s23, %s494_s24  }
 0x133   :  { %489 = dma.done.wait [#allocation4], 256  }
 0x134   :  { %490 = vsyncadd [#allocation4], 4294967040 }
 0x135   :  { %324 = vsyncpa [#allocation3], 1 }
 0x136   :  { %325 = vsyncpa [#allocation6], 1 }
 0x137   :  { %326 = vsyncpa [#allocation4], 1 }

</bundles_post_ra>
